<compile_context>
chip_gen: v6e
topology: v6e:2x2x1
jax: 0.10.0
libtpu: 0.0.40
codegen_flags: <defaults>
</compile_context>

<pallas_src>
import numpy as np
import jax
import jax.numpy as jnp
from jax.experimental import pallas as pl
from jax.experimental.pallas import tpu as pltpu


def _round_up(x: int, m: int) -> int:
    return ((x + m - 1) // m) * m


BLK = 8                                   # timesteps per scan block (= sublanes)
N_STEPS = 3                               # log2(BLK) doubling steps
R_ROWS = _round_up(2 * N_STEPS + 2 * BLK, 8)   # rows of the lambda-power table


def _make_lru_kernel(TL: int, S_pad: int, D_pad: int, *, reverse: bool,
                     add_skip: bool, accumulate: bool):
    """Direction-specialized kernel body. TL must be a multiple of 8."""
    n_sub = TL // BLK

    def kernel(*refs):
        u_ref, b_ref, c_ref, tab_ref = refs[:4]
        pos = 4
        d_ref = None
        yin_ref = None
        if add_skip:
            d_ref = refs[pos]; pos += 1
        if accumulate:
            yin_ref = refs[pos]; pos += 1
        y_ref, x_sc, carry_sc = refs[pos:pos + 3]

        c_idx = pl.program_id(1)

        # ---- 1) fused (re | im) input projection for this chunk (MXU) -------
        x_sc[...] = jnp.dot(u_ref[...], b_ref[...],
                            preferred_element_type=jnp.float32)

        # carry reset at the first processed chunk of every batch scan
        @pl.when(c_idx == 0)
        def _():
            carry_sc[...] = jnp.zeros_like(carry_sc)

        # ---- hoisted, loop-invariant lambda-power tables ---------------------
        # rows [0:N_STEPS]           : Re(lambda^{2^k})
        # rows [N_STEPS:2*N_STEPS]   : Im(lambda^{2^k})
        # rows [2N:2N+BLK]           : Re(P), carry-incorporation powers
        # rows [2N+BLK:2N+2BLK]      : Im(P)
        pows = []
        for k in range(N_STEPS):
            pr = jnp.broadcast_to(tab_ref[k:k + 1, :], (BLK, S_pad))
            pi = jnp.broadcast_to(tab_ref[N_STEPS + k:N_STEPS + k + 1, :],
                                  (BLK, S_pad))
            pows.append((pr, pi))
        Pr = tab_ref[2 * N_STEPS:2 * N_STEPS + BLK, :]
        Pi = tab_ref[2 * N_STEPS + BLK:2 * N_STEPS + 2 * BLK, :]

        # ---- 2) chunked complex diagonal recurrence --------------------------
        # Within each (BLK, S_pad) block: log-depth Hillis-Steele scan; the
        # cross-block carry is folded in with one broadcast complex MAC.
        def sub_body(s, carry):
            cr, ci = carry                                    # (1, S_pad) each
            sub = (n_sub - 1 - s) if reverse else s
            row = pl.multiple_of(sub * BLK, BLK)
            br = x_sc[pl.ds(row, BLK), pl.ds(0, S_pad)]       # (BLK, S_pad)
            bi = x_sc[pl.ds(row, BLK), pl.ds(S_pad, S_pad)]

            for k in range(N_STEPS):                          # doubling steps
                d = 1 << k
                pr, pi = pows[k]
                z = jnp.zeros((d, S_pad), jnp.float32)
                if reverse:      # suffix scan: combine with row t+d
                    sbr = jnp.concatenate([br[d:, :], z], axis=0)
                    sbi = jnp.concatenate([bi[d:, :], z], axis=0)
                else:            # prefix scan: combine with row t-d
                    sbr = jnp.concatenate([z, br[:BLK - d, :]], axis=0)
                    sbi = jnp.concatenate([z, bi[:BLK - d, :]], axis=0)
                br = br + pr * sbr - pi * sbi
                bi = bi + pr * sbi + pi * sbr

            # fold in the cross-block carry: x = within + lambda^{...} * carry
            crb = jnp.broadcast_to(cr, (BLK, S_pad))
            cib = jnp.broadcast_to(ci, (BLK, S_pad))
            xr = br + Pr * crb - Pi * cib
            xi = bi + Pr * cib + Pi * crb

            x_sc[pl.ds(row, BLK), pl.ds(0, S_pad)] = xr       # aligned stores
            x_sc[pl.ds(row, BLK), pl.ds(S_pad, S_pad)] = xi

            j = 0 if reverse else BLK - 1                     # new carry row
            return (xr[j:j + 1, :], xi[j:j + 1, :])

        carry0 = (carry_sc[0:1, :], carry_sc[1:2, :])
        unroll = 2 if n_sub > 1 else 1
        cr_f, ci_f = jax.lax.fori_loop(0, n_sub, sub_body, carry0,
                                       unroll=unroll)
        carry_sc[0:1, :] = cr_f
        carry_sc[1:2, :] = ci_f

        # ---- 3) fused Re(x @ C.mT) output projection -------------------------
        # TODO(synk): interleave this matmul per sub-block with the scan to
        # hide MXU time under the recurrence; optionally bf16-cast the
        # projection operands once the 1e-4 tolerance is re-validated.
        y = jnp.dot(x_sc[...], c_ref[...], preferred_element_type=jnp.float32)
        if add_skip:
            y = y + u_ref[...] * d_ref[...]                   # skip u*D (fwd only)
        if accumulate:
            y = y + yin_ref[...]                              # += forward output
        y_ref[...] = y

    return kernel


def lru_forward(x, params, *, bidirectional: bool, state_dim: int,
                chunk_len=None):
    """Pallas implementation of LRU.forward (state=None).

    The PyTorch 'loop' and 'scan' modes compute the same function; here it is
    realised as a chunked log-depth scan.
    """
    Bsz, L, D = x.shape
    S = state_dim

    S_pad = _round_up(S, 128)            # lane-dense state planes
    D_pad = _round_up(D, 128)            # lane-dense input / output
    if chunk_len is None:
        TL = min(1024, _round_up(L, 8))
    else:
        if chunk_len % 8 != 0:
            raise ValueError("chunk_len must be a multiple of 8")
        TL = chunk_len
    L_pad = _round_up(L, TL)
    nL = L_pad // TL

    f32 = jnp.float32

    # ---- host-side parameter prep --------------------------------------------
    lam_abs = jnp.exp(-jnp.exp(params["log_nu"])).astype(f32)
    theta = jnp.exp(params["log_theta"]).astype(f32)
    gamma = jnp.exp(params["log_gamma"])
    Bn_re = (params["B_re"] * gamma[:, None]).astype(f32)
    Bn_im = (params["B_im"] * gamma[:, None]).astype(f32)
    C_re, C_im = params["C_re"].astype(f32), params["C_im"].astype(f32)

    def fuse_dir(sl):
        Bf = jnp.zeros((D_pad, 2 * S_pad), f32)
        Bf = Bf.at[:D, :S].set(Bn_re[sl].T)
        Bf = Bf.at[:D, S_pad:S_pad + S].set(Bn_im[sl].T)
        Cf = jnp.zeros((2 * S_pad, D_pad), f32)
        Cf = Cf.at[:S, :D].set(C_re[:, sl].T)
        Cf = Cf.at[S_pad:S_pad + S, :D].set(-C_im[:, sl].T)
        return Bf, Cf

    def tables_dir(sl, reverse):
        la, th = lam_abs[sl], theta[sl]
        tab = jnp.zeros((R_ROWS, S_pad), f32)
        for k in range(N_STEPS):                  # lambda^{2^k} rows
            n = float(1 << k)
            mag = la ** n
            tab = tab.at[k, :S].set(mag * jnp.cos(n * th))
            tab = tab.at[N_STEPS + k, :S].set(mag * jnp.sin(n * th))
        for t in range(BLK):                      # carry-incorporation powers
            n = float(BLK - t) if reverse else float(t + 1)
            mag = la ** n
            tab = tab.at[2 * N_STEPS + t, :S].set(mag * jnp.cos(n * th))
            tab = tab.at[2 * N_STEPS + BLK + t, :S].set(mag * jnp.sin(n * th))
        return tab

    d_vec = jnp.zeros((1, D_pad), f32).at[0, :D].set(params["D"].astype(f32))
    # zero-padding the time axis is exact for both scan directions (zero init)
    x_pad = jnp.zeros((Bsz, L_pad, D_pad), f32).at[:, :L, :D].set(x.astype(f32))

    # VMEM budget (bytes): double-buffered (TL,D_pad) blocks for u / y / y_in,
    # x scratch, fused B/C blocks, tables; 2x headroom, cap below v7x's 64 MiB.
    est_elems = (6 * TL * D_pad + TL * 2 * S_pad + 4 * D_pad * 2 * S_pad
                 + 2 * R_ROWS * S_pad + 2 * D_pad + 2 * S_pad)
    vmem_limit = int(min(max(8 * est_elems, 16 * 2 ** 20), 48 * 2 ** 20))

    def call_dir(sl, *, reverse, add_skip, y_acc):
        Bf, Cf = fuse_dir(sl)
        tab = tables_dir(sl, reverse)
        accumulate = y_acc is not None
        kernel = _make_lru_kernel(TL, S_pad, D_pad, reverse=reverse,
                                  add_skip=add_skip, accumulate=accumulate)
        if reverse:
            tc = lambda b, c: (b, nL - 1 - c, 0)    # chunks in reverse time order
        else:
            tc = lambda b, c: (b, c, 0)

        in_specs = [pl.BlockSpec((None, TL, D_pad), tc),
                    pl.BlockSpec((D_pad, 2 * S_pad), lambda b, c: (0, 0)),
                    pl.BlockSpec((2 * S_pad, D_pad), lambda b, c: (0, 0)),
                    pl.BlockSpec((R_ROWS, S_pad), lambda b, c: (0, 0))]
        inputs = [x_pad, Bf, Cf, tab]
        if add_skip:
            in_specs.append(pl.BlockSpec((1, D_pad), lambda b, c: (0, 0)))
            inputs.append(d_vec)
        aliases = {}
        if accumulate:
            in_specs.append(pl.BlockSpec((None, TL, D_pad), tc))
            inputs.append(y_acc)
            aliases = {len(inputs) - 1: 0}          # accumulate in place (P8)

        # TODO(synk): for Bsz == 1 on v7x, split the batch/sequence so both
        # TensorCores are fed (the chunk axis must stay innermost+arbitrary).
        return pl.pallas_call(
            kernel,
            out_shape=jax.ShapeDtypeStruct((Bsz, L_pad, D_pad), f32),
            grid=(Bsz, nL),
            in_specs=in_specs,
            out_specs=pl.BlockSpec((None, TL, D_pad), tc),
            scratch_shapes=[pltpu.VMEM((TL, 2 * S_pad), f32),
                            pltpu.VMEM((2, S_pad), f32)],
            input_output_aliases=aliases,
            compiler_params=pltpu.CompilerParams(
                dimension_semantics=("parallel", "arbitrary"),
                vmem_limit_bytes=vmem_limit),
        )(*inputs)

    # forward direction (includes the u*D skip); backward accumulates into it
    y = call_dir(slice(0, S), reverse=False, add_skip=True, y_acc=None)
    if bidirectional:
        y = call_dir(slice(S, 2 * S), reverse=True, add_skip=False, y_acc=y)
    return y[:, :L, :D]


def init_params(key, input_dim, state_dim, r_min, r_max, phase_max, bidirectional):
    """Deterministic synthetic init mirroring LRU.__init__ parameter shapes."""
    S2 = state_dim * (2 if bidirectional else 1)
    k = jax.random.split(key, 7)
    r_unit = jax.random.uniform(k[0], (S2,))
    r_init = r_unit * (r_max ** 2 - r_min ** 2) + r_min ** 2
    log_nu = jnp.log(-0.5 * jnp.log(r_init))
    theta_init = phase_max * jax.random.uniform(k[1], (S2,))
    log_theta = jnp.log(theta_init)
    scale = 1.0 / np.sqrt(2 * input_dim)
    B_re = jax.random.normal(k[2], (S2, input_dim)) * scale
    B_im = jax.random.normal(k[3], (S2, input_dim)) * scale
    C_re = jax.random.normal(k[4], (input_dim, S2)) * scale
    C_im = jax.random.normal(k[5], (input_dim, S2)) * scale
    Dv = jax.random.normal(k[6], (input_dim,))
    lam_abs = jnp.exp(-jnp.exp(log_nu))
    log_gamma = jnp.log(jnp.sqrt(1.0 - lam_abs ** 2))
    return dict(log_nu=log_nu, log_theta=log_theta, B_re=B_re, B_im=B_im,
                C_re=C_re, C_im=C_im, D=Dv, log_gamma=log_gamma)


def lru_reference(x, params, *, bidirectional, state_dim):
    """NumPy reference: literal transcription of LRU._forward_loop."""
    S = state_dim
    p = {k: np.asarray(v) for k, v in params.items()}
    x = np.asarray(x)
    lam = np.exp(-np.exp(p["log_nu"]) + 1j * np.exp(p["log_theta"]))
    gamma = np.exp(p["log_gamma"])
    Bc = (p["B_re"] + 1j * p["B_im"]) * gamma[:, None]
    Cc = p["C_re"] + 1j * p["C_im"]
    ubn = x.astype(np.complex64) @ Bc.T
    if bidirectional:
        ubn = np.concatenate([ubn[:, :, :S], ubn[:, ::-1, S:]], axis=-1)
    Bsz, L, _ = x.shape
    xs = np.zeros_like(ubn)
    xt = np.zeros((Bsz, ubn.shape[-1]), dtype=ubn.dtype)
    for t in range(L):
        xt = lam * xt + ubn[:, t]
        xs[:, t] = xt
    if bidirectional:
        xs = np.concatenate([xs[:, :, :S], xs[:, ::-1, S:]], axis=-1)
    return np.real(xs @ Cc.T) + x * p["D"]


if __name__ == "__main__":
    # TODO(synk): the torch associative_scan 'scan' mode is realized by the
    # same chunked recurrence; outputs are identical to 'loop' mode.
    key = jax.random.PRNGKey(0)

    configs = [
        # multi-chunk bidirectional with a partially padded last chunk:
        # exercises the cross-chunk carry and the reversed-chunk backward scan
        dict(batch=2, seq_len=20, input_dim=8, state_dim=4,
             bidirectional=True, chunk_len=8),
        dict(batch=2, seq_len=8, input_dim=8, state_dim=4,
             bidirectional=True, chunk_len=None),
        dict(batch=2, seq_len=16, input_dim=8, state_dim=4,
             bidirectional=False, chunk_len=None),
        # odd number of 8-row blocks per chunk + batch=1
        dict(batch=1, seq_len=40, input_dim=8, state_dim=4,
             bidirectional=True, chunk_len=24),
    ]
    for i, cfg in enumerate(configs):
        pkey, xkey = jax.random.split(jax.random.fold_in(key, i))
        params = init_params(pkey, cfg["input_dim"], cfg["state_dim"],
                             r_min=0.4, r_max=0.9, phase_max=6.28,
                             bidirectional=cfg["bidirectional"])
        x = jax.random.normal(
            xkey, (cfg["batch"], cfg["seq_len"], cfg["input_dim"]),
            dtype=jnp.float32)

        y = lru_forward(x, params, bidirectional=cfg["bidirectional"],
                        state_dim=cfg["state_dim"], chunk_len=cfg["chunk_len"])
        y = jax.block_until_ready(y)

        y_ref = lru_reference(x, params, bidirectional=cfg["bidirectional"],
                              state_dim=cfg["state_dim"])
        np.testing.assert_allclose(np.asarray(y), y_ref, rtol=1e-4, atol=1e-4)

    print("KERNEL_OK")
</pallas_src>

<mosaic_0001>
module attributes {stable_mosaic.version = 11 : i64} {
  func.func @kernel(%arg0: i32, %arg1: i32, %arg2: memref<1x8x128xf32, #tpu.memory_space<vmem>>, %arg3: memref<128x256xf32, #tpu.memory_space<vmem>>, %arg4: memref<256x128xf32, #tpu.memory_space<vmem>>, %arg5: memref<24x128xf32, #tpu.memory_space<vmem>>, %arg6: memref<1x128xf32, #tpu.memory_space<vmem>>, %arg7: memref<1x8x128xf32, #tpu.memory_space<vmem>>, %arg8: memref<8x256xf32, #tpu.memory_space<vmem>>, %arg9: memref<2x128xf32, #tpu.memory_space<vmem>>) attributes {dimension_semantics = [#tpu.dimension_semantics<parallel>, #tpu.dimension_semantics<arbitrary>], iteration_bounds = array<i64: 2, 3>, scalar_prefetch = 0 : i64, scratch_operands = 2 : i64, tpu.core_type = #tpu.core_type<tc>, window_params = [{transform_indices = @transform_0, window_bounds = array<i64: 1, 8, 128>}, {pipeline_mode = #tpu.pipeline_mode<synchronous>, transform_indices = @transform_1, window_bounds = array<i64: 128, 256>}, {pipeline_mode = #tpu.pipeline_mode<synchronous>, transform_indices = @transform_2, window_bounds = array<i64: 256, 128>}, {pipeline_mode = #tpu.pipeline_mode<synchronous>, transform_indices = @transform_3, window_bounds = array<i64: 24, 128>}, {pipeline_mode = #tpu.pipeline_mode<synchronous>, transform_indices = @transform_4, window_bounds = array<i64: 1, 128>}, {transform_indices = @transform_5, window_bounds = array<i64: 1, 8, 128>}]} {
    %c0 = arith.constant 0 : index
    %c0_0 = arith.constant 0 : index
    %c0_1 = arith.constant 0 : index
    %0 = vector.load %arg2[%c0, %c0_0, %c0_1] : memref<1x8x128xf32, #tpu.memory_space<vmem>>, vector<1x8x128xf32>
    %1 = vector.shape_cast %0 : vector<1x8x128xf32> to vector<8x128xf32>
    %c0_2 = arith.constant 0 : index
    %c0_3 = arith.constant 0 : index
    %2 = vector.load %arg3[%c0_2, %c0_3] : memref<128x256xf32, #tpu.memory_space<vmem>>, vector<128x256xf32>
    %cst = arith.constant dense<0.000000e+00> : vector<8x256xf32>
    %3 = tpu.matmul %1, %2, %cst {dimension_numbers = #tpu.dot_dimension_numbers<[1], [0], [0], [1], [0, 0, 1, 1], [], []>} : vector<8x128xf32>, vector<128x256xf32>, vector<8x256xf32> -> vector<8x256xf32>
    %c0_4 = arith.constant 0 : index
    %c0_5 = arith.constant 0 : index
    %4 = vector.load %arg8[%c0_4, %c0_5] : memref<8x256xf32, #tpu.memory_space<vmem>>, vector<8x256xf32>
    tpu.vector_store %arg8[%c0_4, %c0_5], %3 {strides = array<i32>} : memref<8x256xf32, #tpu.memory_space<vmem>>, vector<8x256xf32>,
    %c0_i32 = arith.constant 0 : i32
    %5 = arith.cmpi eq, %arg1, %c0_i32 : i32
    %6 = arith.extui %5 : i1 to i32
    %c0_i32_6 = arith.constant 0 : i32
    %7 = arith.cmpi ne, %6, %c0_i32_6 : i32
    scf.if %7 {
      %cst_44 = arith.constant 0.000000e+00 : f32
      %107 = vector.broadcast %cst_44 : f32 to vector<2x128xf32>
      %c0_45 = arith.constant 0 : index
      %c0_46 = arith.constant 0 : index
      %108 = vector.load %arg9[%c0_45, %c0_46] : memref<2x128xf32, #tpu.memory_space<vmem>>, vector<2x128xf32>
      tpu.vector_store %arg9[%c0_45, %c0_46], %107 {strides = array<i32>} : memref<2x128xf32, #tpu.memory_space<vmem>>, vector<2x128xf32>,
    } else {
    }
    %c0_7 = arith.constant 0 : index
    %c0_8 = arith.constant 0 : index
    %8 = vector.load %arg5[%c0_7, %c0_8] : memref<24x128xf32, #tpu.memory_space<vmem>>, vector<1x128xf32>
    %9 = vector.shape_cast %8 : vector<1x128xf32> to vector<1x128xf32>
    %10 = vector.broadcast %9 : vector<1x128xf32> to vector<8x128xf32>
    %c3 = arith.constant 3 : index
    %c0_9 = arith.constant 0 : index
    %11 = vector.load %arg5[%c3, %c0_9] : memref<24x128xf32, #tpu.memory_space<vmem>>, vector<1x128xf32>
    %12 = vector.shape_cast %11 : vector<1x128xf32> to vector<1x128xf32>
    %13 = vector.broadcast %12 : vector<1x128xf32> to vector<8x128xf32>
    %c1 = arith.constant 1 : index
    %c0_10 = arith.constant 0 : index
    %14 = vector.load %arg5[%c1, %c0_10] : memref<24x128xf32, #tpu.memory_space<vmem>>, vector<1x128xf32>
    %15 = vector.shape_cast %14 : vector<1x128xf32> to vector<1x128xf32>
    %16 = vector.broadcast %15 : vector<1x128xf32> to vector<8x128xf32>
    %c4 = arith.constant 4 : index
    %c0_11 = arith.constant 0 : index
    %17 = vector.load %arg5[%c4, %c0_11] : memref<24x128xf32, #tpu.memory_space<vmem>>, vector<1x128xf32>
    %18 = vector.shape_cast %17 : vector<1x128xf32> to vector<1x128xf32>
    %19 = vector.broadcast %18 : vector<1x128xf32> to vector<8x128xf32>
    %c2 = arith.constant 2 : index
    %c0_12 = arith.constant 0 : index
    %20 = vector.load %arg5[%c2, %c0_12] : memref<24x128xf32, #tpu.memory_space<vmem>>, vector<1x128xf32>
    %21 = vector.shape_cast %20 : vector<1x128xf32> to vector<1x128xf32>
    %22 = vector.broadcast %21 : vector<1x128xf32> to vector<8x128xf32>
    %c5 = arith.constant 5 : index
    %c0_13 = arith.constant 0 : index
    %23 = vector.load %arg5[%c5, %c0_13] : memref<24x128xf32, #tpu.memory_space<vmem>>, vector<1x128xf32>
    %24 = vector.shape_cast %23 : vector<1x128xf32> to vector<1x128xf32>
    %25 = vector.broadcast %24 : vector<1x128xf32> to vector<8x128xf32>
    %c6 = arith.constant 6 : index
    %c0_14 = arith.constant 0 : index
    %26 = vector.load %arg5[%c6, %c0_14] : memref<24x128xf32, #tpu.memory_space<vmem>>, vector<8x128xf32>
    %c14 = arith.constant 14 : index
    %c0_15 = arith.constant 0 : index
    %27 = vector.load %arg5[%c14, %c0_15] : memref<24x128xf32, #tpu.memory_space<vmem>>, vector<8x128xf32>
    %c0_16 = arith.constant 0 : index
    %c0_17 = arith.constant 0 : index
    %28 = vector.load %arg9[%c0_16, %c0_17] : memref<2x128xf32, #tpu.memory_space<vmem>>, vector<1x128xf32>
    %c1_18 = arith.constant 1 : index
    %c0_19 = arith.constant 0 : index
    %29 = vector.load %arg9[%c1_18, %c0_19] : memref<2x128xf32, #tpu.memory_space<vmem>>, vector<1x128xf32>
    %c0_i32_20 = arith.constant 0 : i32
    %c8_i32 = arith.constant 8 : i32
    %30 = arith.muli %c0_i32_20, %c8_i32 : i32
    %31 = tpu.assume_multiple %30, 8 : i32
    %32 = arith.index_cast %31 : i32 to index
    %c0_21 = arith.constant 0 : index
    %33 = vector.load %arg8[%32, %c0_21] : memref<8x256xf32, #tpu.memory_space<vmem>>, vector<8x128xf32>
    %34 = arith.index_cast %31 : i32 to index
    %c128 = arith.constant 128 : index
    %35 = vector.load %arg8[%34, %c128] : memref<8x256xf32, #tpu.memory_space<vmem>>, vector<8x128xf32>
    %cst_22 = arith.constant 0.000000e+00 : f32
    %36 = vector.broadcast %cst_22 : f32 to vector<1x128xf32>
    %37 = vector.extract_strided_slice %33 {offsets = [0, 0], sizes = [7, 128], strides = [1, 1]} : vector<8x128xf32> to vector<7x128xf32>
    %38 = tpu.concatenate %36, %37 in 0 : vector<1x128xf32>, vector<7x128xf32> -> vector<8x128xf32>
    %39 = vector.extract_strided_slice %35 {offsets = [0, 0], sizes = [7, 128], strides = [1, 1]} : vector<8x128xf32> to vector<7x128xf32>
    %40 = tpu.concatenate %36, %39 in 0 : vector<1x128xf32>, vector<7x128xf32> -> vector<8x128xf32>
    %41 = arith.mulf %10, %38 : vector<8x128xf32>
    %42 = arith.addf %33, %41 : vector<8x128xf32>
    %43 = arith.mulf %13, %40 : vector<8x128xf32>
    %44 = arith.subf %42, %43 : vector<8x128xf32>
    %45 = arith.mulf %10, %40 : vector<8x128xf32>
    %46 = arith.addf %35, %45 : vector<8x128xf32>
    %47 = arith.mulf %13, %38 : vector<8x128xf32>
    %48 = arith.addf %46, %47 : vector<8x128xf32>
    %cst_23 = arith.constant 0.000000e+00 : f32
    %49 = vector.broadcast %cst_23 : f32 to vector<2x128xf32>
    %50 = vector.extract_strided_slice %44 {offsets = [0, 0], sizes = [6, 128], strides = [1, 1]} : vector<8x128xf32> to vector<6x128xf32>
    %51 = tpu.concatenate %49, %50 in 0 : vector<2x128xf32>, vector<6x128xf32> -> vector<8x128xf32>
    %52 = vector.extract_strided_slice %48 {offsets = [0, 0], sizes = [6, 128], strides = [1, 1]} : vector<8x128xf32> to vector<6x128xf32>
    %53 = tpu.concatenate %49, %52 in 0 : vector<2x128xf32>, vector<6x128xf32> -> vector<8x128xf32>
    %54 = arith.mulf %16, %51 : vector<8x128xf32>
    %55 = arith.addf %44, %54 : vector<8x128xf32>
    %56 = arith.mulf %19, %53 : vector<8x128xf32>
    %57 = arith.subf %55, %56 : vector<8x128xf32>
    %58 = arith.mulf %16, %53 : vector<8x128xf32>
    %59 = arith.addf %48, %58 : vector<8x128xf32>
    %60 = arith.mulf %19, %51 : vector<8x128xf32>
    %61 = arith.addf %59, %60 : vector<8x128xf32>
    %cst_24 = arith.constant 0.000000e+00 : f32
    %62 = vector.broadcast %cst_24 : f32 to vector<4x128xf32>
    %63 = vector.extract_strided_slice %57 {offsets = [0, 0], sizes = [4, 128], strides = [1, 1]} : vector<8x128xf32> to vector<4x128xf32>
    %64 = tpu.concatenate %62, %63 in 0 : vector<4x128xf32>, vector<4x128xf32> -> vector<8x128xf32>
    %65 = vector.extract_strided_slice %61 {offsets = [0, 0], sizes = [4, 128], strides = [1, 1]} : vector<8x128xf32> to vector<4x128xf32>
    %66 = tpu.concatenate %62, %65 in 0 : vector<4x128xf32>, vector<4x128xf32> -> vector<8x128xf32>
    %67 = arith.mulf %22, %64 : vector<8x128xf32>
    %68 = arith.addf %57, %67 : vector<8x128xf32>
    %69 = arith.mulf %25, %66 : vector<8x128xf32>
    %70 = arith.subf %68, %69 : vector<8x128xf32>
    %71 = arith.mulf %22, %66 : vector<8x128xf32>
    %72 = arith.addf %61, %71 : vector<8x128xf32>
    %73 = arith.mulf %25, %64 : vector<8x128xf32>
    %74 = arith.addf %72, %73 : vector<8x128xf32>
    %75 = vector.shape_cast %28 : vector<1x128xf32> to vector<1x128xf32>
    %76 = vector.broadcast %75 : vector<1x128xf32> to vector<8x128xf32>
    %77 = vector.shape_cast %29 : vector<1x128xf32> to vector<1x128xf32>
    %78 = vector.broadcast %77 : vector<1x128xf32> to vector<8x128xf32>
    %79 = arith.mulf %26, %76 : vector<8x128xf32>
    %80 = arith.addf %70, %79 : vector<8x128xf32>
    %81 = arith.mulf %27, %78 : vector<8x128xf32>
    %82 = arith.subf %80, %81 : vector<8x128xf32>
    %83 = arith.mulf %26, %78 : vector<8x128xf32>
    %84 = arith.addf %74, %83 : vector<8x128xf32>
    %85 = arith.mulf %27, %76 : vector<8x128xf32>
    %86 = arith.addf %84, %85 : vector<8x128xf32>
    %87 = arith.index_cast %31 : i32 to index
    %c0_25 = arith.constant 0 : index
    %88 = vector.load %arg8[%87, %c0_25] : memref<8x256xf32, #tpu.memory_space<vmem>>, vector<8x128xf32>
    tpu.vector_store %arg8[%87, %c0_25], %82 {strides = array<i32>} : memref<8x256xf32, #tpu.memory_space<vmem>>, vector<8x128xf32>,
    %89 = arith.index_cast %31 : i32 to index
    %c128_26 = arith.constant 128 : index
    %90 = vector.load %arg8[%89, %c128_26] : memref<8x256xf32, #tpu.memory_space<vmem>>, vector<8x128xf32>
    tpu.vector_store %arg8[%89, %c128_26], %86 {strides = array<i32>} : memref<8x256xf32, #tpu.memory_space<vmem>>, vector<8x128xf32>,
    %91 = vector.extract_strided_slice %82 {offsets = [7, 0], sizes = [1, 128], strides = [1, 1]} : vector<8x128xf32> to vector<1x128xf32>
    %92 = vector.extract_strided_slice %86 {offsets = [7, 0], sizes = [1, 128], strides = [1, 1]} : vector<8x128xf32> to vector<1x128xf32>
    %c1_i32 = arith.constant 1 : i32
    %c0_27 = arith.constant 0 : index
    %c0_28 = arith.constant 0 : index
    %93 = vector.load %arg9[%c0_27, %c0_28] : memref<2x128xf32, #tpu.memory_space<vmem>>, vector<1x128xf32>
    tpu.vector_store %arg9[%c0_27, %c0_28], %91 {strides = array<i32>} : memref<2x128xf32, #tpu.memory_space<vmem>>, vector<1x128xf32>,
    %c1_29 = arith.constant 1 : index
    %c0_30 = arith.constant 0 : index
    %94 = vector.load %arg9[%c1_29, %c0_30] : memref<2x128xf32, #tpu.memory_space<vmem>>, vector<1x128xf32>
    tpu.vector_store %arg9[%c1_29, %c0_30], %92 {strides = array<i32>} : memref<2x128xf32, #tpu.memory_space<vmem>>, vector<1x128xf32>,
    %c0_31 = arith.constant 0 : index
    %c0_32 = arith.constant 0 : index
    %95 = vector.load %arg8[%c0_31, %c0_32] : memref<8x256xf32, #tpu.memory_space<vmem>>, vector<8x256xf32>
    %c0_33 = arith.constant 0 : index
    %c0_34 = arith.constant 0 : index
    %96 = vector.load %arg4[%c0_33, %c0_34] : memref<256x128xf32, #tpu.memory_space<vmem>>, vector<256x128xf32>
    %cst_35 = arith.constant dense<0.000000e+00> : vector<8x128xf32>
    %97 = tpu.matmul %95, %96, %cst_35 {dimension_numbers = #tpu.dot_dimension_numbers<[1], [0], [0], [1], [0, 0, 1, 1], [], []>} : vector<8x256xf32>, vector<256x128xf32>, vector<8x128xf32> -> vector<8x128xf32>
    %c0_36 = arith.constant 0 : index
    %c0_37 = arith.constant 0 : index
    %c0_38 = arith.constant 0 : index
    %98 = vector.load %arg2[%c0_36, %c0_37, %c0_38] : memref<1x8x128xf32, #tpu.memory_space<vmem>>, vector<1x8x128xf32>
    %99 = vector.shape_cast %98 : vector<1x8x128xf32> to vector<8x128xf32>
    %c0_39 = arith.constant 0 : index
    %c0_40 = arith.constant 0 : index
    %100 = vector.load %arg6[%c0_39, %c0_40] : memref<1x128xf32, #tpu.memory_space<vmem>>, vector<1x128xf32>
    %101 = vector.broadcast %100 : vector<1x128xf32> to vector<8x128xf32>
    %102 = arith.mulf %99, %101 : vector<8x128xf32>
    %103 = arith.addf %97, %102 : vector<8x128xf32>
    %c0_41 = arith.constant 0 : index
    %c0_42 = arith.constant 0 : index
    %c0_43 = arith.constant 0 : index
    %104 = vector.load %arg7[%c0_41, %c0_42, %c0_43] : memref<1x8x128xf32, #tpu.memory_space<vmem>>, vector<1x8x128xf32>
    %105 = vector.shape_cast %104 : vector<1x8x128xf32> to vector<8x128xf32>
    %106 = vector.shape_cast %103 : vector<8x128xf32> to vector<1x8x128xf32>
    tpu.vector_store %arg7[%c0_41, %c0_42, %c0_43], %106 {strides = array<i32>} : memref<1x8x128xf32, #tpu.memory_space<vmem>>, vector<1x8x128xf32>,
    return
  }
  func.func @transform_0(%arg0: i32, %arg1: i32) -> (i32, i32, i32) {
    %c0_i32 = arith.constant 0 : i32
    %c0_i32_0 = arith.constant 0 : i32
    return %arg0, %arg1, %c0_i32 : i32, i32, i32
  }
  func.func @transform_1(%arg0: i32, %arg1: i32) -> (i32, i32) {
    %c0_i32 = arith.constant 0 : i32
    %c0_i32_0 = arith.constant 0 : i32
    %c0_i32_1 = arith.constant 0 : i32
    return %c0_i32, %c0_i32_0 : i32, i32
  }
  func.func @transform_2(%arg0: i32, %arg1: i32) -> (i32, i32) {
    %c0_i32 = arith.constant 0 : i32
    %c0_i32_0 = arith.constant 0 : i32
    %c0_i32_1 = arith.constant 0 : i32
    return %c0_i32, %c0_i32_0 : i32, i32
  }
  func.func @transform_3(%arg0: i32, %arg1: i32) -> (i32, i32) {
    %c0_i32 = arith.constant 0 : i32
    %c0_i32_0 = arith.constant 0 : i32
    %c0_i32_1 = arith.constant 0 : i32
    return %c0_i32, %c0_i32_0 : i32, i32
  }
  func.func @transform_4(%arg0: i32, %arg1: i32) -> (i32, i32) {
    %c0_i32 = arith.constant 0 : i32
    %c0_i32_0 = arith.constant 0 : i32
    %c0_i32_1 = arith.constant 0 : i32
    return %c0_i32, %c0_i32_0 : i32, i32
  }
  func.func @transform_5(%arg0: i32, %arg1: i32) -> (i32, i32, i32) {
    %c0_i32 = arith.constant 0 : i32
    %c0_i32_0 = arith.constant 0 : i32
    return %arg0, %arg1, %c0_i32 : i32, i32, i32
  }
}

</mosaic_0001>

<bundles_post_ra>
// kernel: tpu_custom_call.1
= control target key start
LH: loop header
LB: loop body
LE: loop exit
PB: predicated region body
PF: predicated region fallthrough
CT: control target
= control target key end

     0   :  { %s1431_s0 = inlined_call_operand.hbm [shape: f32[2,24,128], index: 0, kind: input, shape index: {}]   ;;  %s1432_s1 = inlined_call_operand.hbm [shape: f32[128,256], index: 1, kind: input, shape index: {}]   ;;  %s1433_s2 = inlined_call_operand.hbm [shape: f32[256,128], index: 2, kind: input, shape index: {}]   ;;  %s1434_s3 = inlined_call_operand.hbm [shape: f32[24,128], index: 3, kind: input, shape index: {}]   ;;  %s1435_s4 = inlined_call_operand.vmem [shape: f32[1,128], index: 4, kind: input, shape index: {}]   ;;  %s1436_s5 = inlined_call_operand.hbm [shape: f32[2,24,128], index: 5, kind: output, shape index: {}]  }
   0x1   :  { %1444 = sst [smem:[#allocation20_spill]] %s1432_s1 }
   0x2   :  { %1445 = sst [smem:[#allocation21_spill]] %s1433_s2 }
   0x3   :  { %1446 = sst [smem:[#allocation22_spill]] %s1434_s3 }
   0x4   :  { %1447 = sst [smem:[#allocation23_spill]] %s1436_s5 }
   0x5   :  { %10 = vsyncpa [#allocation5], 0 }
   0x6   :  { %12 = vsyncpa [#allocation5 + $0x1], 0 }
   0x7   :  { %13 = vsyncpa [#allocation8], 0 }
   0x8   :  { %14 = vsyncpa [#allocation11], 0 }
   0x9   :  { %15 = vsyncpa [#allocation6], 0 }
   0xa   :  { %17 = vsyncpa [#allocation6 + $0x1], 0  ;;  %s1201_s18 = smov 0   ;;  %s1203_s19 = smov 0  }
   0xb   :  { %s1205_s20 = smov 0   ;;  %s1207_s21 = smov 0  }
   0xc   :  { %s1209_s22 = smov 0   ;;  %s1211_s23 = smov 0  }
   0xd   :  { %s1213_s24 = smov 0   ;;  %s1215_s25 = smov 0  }
   0xe LB: > { %1448 = sst [smem:[#allocation17_spill]] %s1130_s18  ;;  %s767_s26 = sadd.s32 4294967295, %s1158_s25   ;;  %s1158_s25 = sphi %s1215_s25, %s23_s25   ;;  %s1154_s24 = sphi %s1213_s24, %s1476_s24   ;;  %s1150_s23 = sphi %s1211_s23, %s1475_s23   ;;  %s1146_s22 = sphi %s1209_s22, %s1474_s22   ;;  %s1142_s21 = sphi %s1207_s21, %s1473_s21   ;;  %s1138_s20 = sphi %s1205_s20, %s1472_s20   ;;  %s1134_s19 = sphi %s1203_s19, %s1471_s19   ;;  %s1130_s18 = sphi %s1201_s18, %s1470_s18  }
   0xf   : > { %s768_s27 = sadd.s32 4294967294, %s1158_s25   ;;  %p57_p0 = scmp.ne.s32.totalorder %s1134_s19, %s1130_s18 }
  0x10   : > { %p1245_p1 = scmp.eq.s32.totalorder %s767_s26, 0  ;;  %p1249_p2 = scmp.eq.s32.totalorder %s767_s26, 5 }
  0x11   : > { %p173_p3 = scmp.eq.s32.totalorder %s768_s27, 5  ;;  %p769_p5 = scmp.ge.s32.totalorder %s1158_s25, 1 }
  0x12   : > { %s1449_s28 = scalar_select %p1245_p1, 1, 0 }
  0x13   : > { %p1255_p4 = por %p1245_p1, %p57_p0  ;;  %p1260_p6 = por %p173_p3, %p57_p0 }
  0x14   : > { %p180_p7 = scmp.lt.s32.totalorder %s1158_s25, 7  ;;  %s1160_s8 = smov [#allocation7]  }
  0x15   : > { %s1451_s30 = scalar_select %p1255_p4, 1, 0 }
  0x16   : > { %s1452_s6 = scalar_select %p1260_p6, 1, 0 }
  0x17   : > { %p1265_p8 = pnand %p769_p5, %p180_p7  ;;  %s192_s9 = sshll.u32 %s1160_s8, 4  ;;  %s193_s9 = int_to_ptr.vmem [resolvable:$true] %s192_s9 }
  0x18   : > { %1453 = sst [smem:[#allocation18_spill]] %s1452_s6  ;;  %s1161_s11 = smov [#allocation9]  }
  0x19   : > { %p849_p9 = pneg %p1265_p8  ;;  %s205_s12 = sshll.u32 %s1161_s11, 4  ;;  %s206_s12 = int_to_ptr.vmem [resolvable:$true] %s205_s12 }
  0x1a   : > { %s959_s13 = scalar_lea.vmem %s193_s9, 4096  ;;  %p967_p3 = scmp.lt.s32.totalorder %s193_s9, %s193_s9 }
  0x1b   : > { %p1273_p10 = pnand %p849_p9, %p1245_p1  ;;  %p960_p12 = scmp.ne.s32.totalorder %s193_s9, %s959_s13 }
  0x1c   : > { %p968_p5 = scmp.lt.s32.totalorder %s959_s13, %s959_s13 }
  0x1d   : > { %p950_p11 = pneg %p1273_p10 }
  0x1e   : > { %p969_p7 = por %p968_p5, %p967_p3 }
  0x1f   : > { %p962_p13 = pnand %p960_p12, %p950_p11 }
  0x21   : > { %p963_p0 = pneg %p962_p13 }
  0x23   : > { %p970_p9 = pnand %p969_p7, %p963_p0 }
  0x25   : > { %973 = shalt.err (!%p970_p9)
}
  0x26   : > { %s1162_s14 = smov 256   ;;  %s1163_s15 = smov 16  }
  0x27   : > { %s1456_s1 = sld [smem:[#allocation20_spill]]  ;;  %s985_s26 = scalar_lea.vmem %s206_s12, 4096 }
  0x28   : > { %p986_p6 = scmp.ne.s32.totalorder %s206_s12, %s985_s26  ;;  %p993_p1 = scmp.lt.s32.totalorder %s206_s12, %s206_s12 }
  0x29   : > { %p994_p4 = scmp.lt.s32.totalorder %s985_s26, %s985_s26 }
  0x2a   : > { %p988_p12 = pnand %p986_p6, %p950_p11 }
  0x2b   : > { %p995_p3 = por %p994_p4, %p993_p1 }
  0x2c   : > { %p989_p13 = pneg %p988_p12 }
  0x2d   : > { %852 = dma.hbm_to_vmem [thread:$0]  (!%p1273_p10), %s1456_s1, 4096, %s193_s9, [#allocation8], %s1162_s14, %s1162_s14, %s1163_s15  }
  0x2e   : > { %p996_p0 = pnand %p995_p3, %p989_p13 }
  0x30   : > { %999 = shalt.err (!%p996_p0)
}
  0x31   : > { %s1164_s27 = smov 128   ;;  %s1165_s8 = smov 8  }
  0x32   : > { %s1457_s2 = sld [smem:[#allocation21_spill]]  ;;  %s1166_s9 = smov [#allocation10]  }
  0x33   : > { %s218_s14 = sshll.u32 %s1166_s9, 4  ;;  %s219_s14 = int_to_ptr.vmem [resolvable:$true] %s218_s14 }
  0x34   : > { %s1011_s15 = scalar_lea.vmem %s219_s14, 384  ;;  %p1019_p4 = scmp.lt.s32.totalorder %s219_s14, %s219_s14 }
  0x35   : > { %p1012_p6 = scmp.ne.s32.totalorder %s219_s14, %s1011_s15  ;;  %p1020_p7 = scmp.lt.s32.totalorder %s1011_s15, %s1011_s15 }
  0x37   : > { %p1014_p5 = pnand %p1012_p6, %p950_p11  ;;  %p1021_p9 = por %p1020_p7, %p1019_p4 }
  0x38   : > { %855 = dma.hbm_to_vmem [thread:$0]  (!%p1273_p10), %s1457_s2, 4096, %s206_s12, [#allocation8], %s1164_s27, %s1164_s27, %s1165_s8  }
  0x39   : > { %p1015_p1 = pneg %p1014_p5 }
  0x3b   : > { %p1022_p12 = pnand %p1021_p9, %p1015_p1 }
  0x3d   : > { %1025 = shalt.err (!%p1022_p12)
}
  0x3e   : > { %s1458_s3 = sld [smem:[#allocation22_spill]]  ;;  %s32_s12 = sadd.s32 1, %s1150_s23 }
  0x3f   : > { %p33_p11 = scmp.ge.s32.totalorder %s32_s12, 3  ;;  %s35_s10 = sadd.s32 1, %s1154_s24 }
  0x40   : > { %s44_s26 = sadd.s32 1, %s1138_s20  ;;  %p51_p13 = scmp.ne.s32.totalorder %s1138_s20, %s1134_s19 }
  0x41   : > { %s1478_s12 = smov (%p33_p11, %s32_s12), 0  ;;  %s1480_s10 = smov (!%p33_p11, %s35_s10), %s1154_s24 }
  0x42   : > { %1459 = sst [smem:[#allocation19_spill]] %s1478_s12  ;;  %s40_s11 = ssub.s32 %s1150_s23, %s1478_s12 }
  0x43   : > { %p52_p3 = scmp.eq.s32.totalorder %s1158_s25, 0  ;;  %p37_p0 = scmp.ge.s32.totalorder %s1480_s10, 2 }
  0x44   : > { %858 = dma.hbm_to_vmem [thread:$0]  (!%p1273_p10), %s1458_s3, 384, %s219_s14, [#allocation11], %s1164_s27, %s1164_s27, %s1165_s8  }
  0x45   : > { %p1316_p6 = por %p1249_p2, %p51_p13  ;;  %p1320_p10 = por %p52_p3, %p51_p13 }
  0x46   : > { %p870_p5 = scmp.lt.s32.totalorder %s1158_s25, 6  ;;  %s1482_s10 = smov (%p37_p0, %s1480_s10), 0 }
  0x47   : > { %s235_s8 = sand.u32 1, %s1138_s20   ;;  %s831_s9 = smul.u32 3, %s1154_s24 }
  0x48   : > { %s39_s14 = ssub.s32 %s1154_s24, %s1482_s10  ;;  %s774_s16 = sshll.u32 %s235_s8, 3 }
  0x49   : > { %s41_s15 = sor.u32 %s40_s11, %s39_s14  ;;  %s244_s29 = sadd.s32 %s1150_s23, %s831_s9 }
  0x4a   : > { %p42_p1 = scmp.eq.s32.totalorder %s41_s15, 0  ;;  %s239_s17 = scalar_lea.vmem [#allocation4], %s774_s16 }
  0x4b   : > { %s248_s1 = sshll.u32 %s239_s17, 4  ;;  %s775_s3 = sshll.u32 %s244_s29, 7  ;;  %s249_s1 = int_to_ptr.vmem [resolvable:$true] %s248_s1 }
  0x4c   : > { %s1333_s2 = scalar_select %p42_p1, %s1138_s20, %s44_s26  }
  0x4d   : > { %s246_s18 = scalar_lea.hbm %s1431_s0, %s775_s3  ;;  %p1342_p2 = pnand %p870_p5, %p1320_p10 }
  0x4e   : > { %s236_s11 = scalar_lea.sflag [#allocation5], %s235_s8  ;;  %s1039_s9 = scalar_lea.vmem %s249_s1, 128 }
  0x4f   : > { %p1028_p4 = pneg %p1342_p2  ;;  %p1040_p7 = scmp.ne.s32.totalorder %s249_s1, %s1039_s9 }
  0x50   : > { %s1167_s26 = smov [#allocation4]  }
  0x51   : > { %p1042_p9 = pnand %p1040_p7, %p1028_p4  ;;  %s1044_s14 = sshll.u32 %s1167_s26, 4  ;;  %s1045_s14 = int_to_ptr.vmem [resolvable:$false] %s1044_s14 }
  0x52   : > { %s1046_s15 = scalar_lea.vmem %s1045_s14, 256  ;;  %p1047_p11 = scmp.lt.s32.totalorder %s249_s1, %s1045_s14 }
  0x53   : > { %p1043_p12 = pneg %p1042_p9  ;;  %p1048_p13 = scmp.lt.s32.totalorder %s1046_s15, %s1039_s9 }
  0x55   : > { %p1049_p3 = por %p1048_p13, %p1047_p11 }
  0x57   : > { %p1050_p0 = pnand %p1049_p3, %p1043_p12 }
  0x59   : > { %1053 = shalt.err (!%p1050_p0)
}
  0x5a   : > { %862 = dma.hbm_to_vmem [thread:$0]  (!%p1342_p2), %s246_s18, 128, %s249_s1, %s236_s11  }
  0x5b   : > { %257 = sbr.rel (%p1265_p8) target bundleno = 584 (0x248), region = 40  ;;  %s1353_s3 = sand.u32 (!%p1265_p8), 1, %s1134_s19  }
  0x5c   : > { %s777_s6 = sshll.u32 (!%p1265_p8), %s1353_s3, 3  ;;  %s260_s12 = scalar_lea.sflag (!%p1265_p8), [#allocation5], %s1353_s3 }
  0x5d   : > { %s1359_s27 = scalar_lea.vmem (!%p1265_p8), [#allocation4], %s777_s6  ;;  %p1463_p10 = scmp.ne.s32.totalorder (!%p1265_p8), %s1451_s30, 0 }
  0x60   : > { %1113 = dma.done.wait (%p1463_p10), %s260_s12, 128  }
  0x61   : > { %1115 = vsyncadd (%p1463_p10), %s260_s12, 4294967168  ;;  %p1464_p5 = scmp.ne.s32.totalorder %s1449_s28, 0 }
  0x63   : > { %1117 = dma.done.wait (%p1464_p5), [#allocation8], 8192  }
  0x64   : > { %1119 = vsyncadd (%p1464_p5), [#allocation8], 4294959104 }
  0x65   : > { %1121 = dma.done.wait (%p1464_p5), [#allocation11], 384  }
  0x66   : > { %1123 = vsyncadd (%p1464_p5), [#allocation11], 4294966912  ;;  %v1168_v0 = vmov 0.0   ;;  %v334_v1 = vld [vmem:[#allocation7 + $0xf8] sm:$0xff]  ;;  %v333_v2 = vld [vmem:[#allocation7 + $0xf0] sm:$0xff]  ;;  %s1376_s1 = scalar_lea.vmem [#allocation12], %s777_s6 }
  0x67   : > { %399 = vmatprep.mubr.f32.mxu0 %v1168_v0  ;;  %v332_v3 = vld [vmem:[#allocation7 + $0xe8] sm:$0xff]  ;;  %335 = vmatprep.subr.mxu0 %v334_v1  ;;  %v331_v4 = vld [vmem:[#allocation7 + $0xe0] sm:$0xff]  ;;  %v330_v5 = vld [vmem:[#allocation7 + $0xd8] sm:$0xff]  ;;  %p782_p8 = scmp.ne.s32.totalorder %s1142_s21, 0 }
  0x68   : > { %336 = vmatpush1.msra.mxu0 %v333_v2  ;;  %v329_v6 = vld [vmem:[#allocation7 + $0xd0] sm:$0xff]  ;;  %v328_v7 = vld [vmem:[#allocation7 + $0xc8] sm:$0xff]  ;;  %v327_v8 = vld [vmem:[#allocation7 + $0xc0] sm:$0xff] }
  0x69   : > { %337 = vmatprep.subr.mxu0 %v332_v3  ;;  %v326_v9 = vld [vmem:[#allocation7 + $0xb8] sm:$0xff]  ;;  %v325_v10 = vld [vmem:[#allocation7 + $0xb0] sm:$0xff]  ;;  %v324_v11 = vld [vmem:[#allocation7 + $0xa8] sm:$0xff] }
  0x6a   : > { %338 = vmatpush1.msra.mxu0 %v331_v4  ;;  %v323_v12 = vld [vmem:[#allocation7 + $0xa0] sm:$0xff]  ;;  %v322_v13 = vld [vmem:[#allocation7 + $0x98] sm:$0xff]  ;;  %v321_v14 = vld [vmem:[#allocation7 + $0x90] sm:$0xff] }
  0x6b   : > { %339 = vmatprep.subr.mxu0 %v330_v5  ;;  %v320_v15 = vld [vmem:[#allocation7 + $0x88] sm:$0xff]  ;;  %v319_v16 = vld [vmem:[#allocation7 + $0x80] sm:$0xff]  ;;  %v318_v17 = vld [vmem:[#allocation7 + $0x78] sm:$0xff] }
  0x6c   : > { %340 = vmatpush1.msra.mxu0 %v329_v6  ;;  %v317_v18 = vld [vmem:[#allocation7 + $0x70] sm:$0xff]  ;;  %v316_v19 = vld [vmem:[#allocation7 + $0x68] sm:$0xff]  ;;  %v315_v20 = vld [vmem:[#allocation7 + $0x60] sm:$0xff] }
  0x6d   : > { %341 = vmatprep.subr.mxu0 %v328_v7  ;;  %v314_v21 = vld [vmem:[#allocation7 + $0x58] sm:$0xff]  ;;  %v313_v22 = vld [vmem:[#allocation7 + $0x50] sm:$0xff]  ;;  %v312_v23 = vld [vmem:[#allocation7 + $0x48] sm:$0xff] }
  0x6e   : > { %342 = vmatpush1.msra.mxu0 %v327_v8  ;;  %v311_v24 = vld [vmem:[#allocation7 + $0x40] sm:$0xff]  ;;  %v310_v25 = vld [vmem:[#allocation7 + $0x38] sm:$0xff]  ;;  %v309_v26 = vld [vmem:[#allocation7 + $0x30] sm:$0xff] }
  0x6f   : > { %343 = vmatprep.subr.mxu0 %v326_v9  ;;  %v308_v27 = vld [vmem:[#allocation7 + $0x28] sm:$0xff]  ;;  %v307_v28 = vld [vmem:[#allocation7 + $0x20] sm:$0xff]  ;;  %v306_v29 = vld [vmem:[#allocation7 + $0x18] sm:$0xff] }
  0x70   : > { %344 = vmatpush1.msra.mxu0 %v325_v10  ;;  %v305_v30 = vld [vmem:[#allocation7 + $0x10] sm:$0xff]  ;;  %v304_v31 = vld [vmem:[#allocation7 + $0x8] sm:$0xff]  ;;  %v303_v32 = vld [vmem:[#allocation7] sm:$0xff] }
  0x71   : > { %345 = vmatprep.subr.mxu0 %v324_v11  ;;  %v302_v33 = vld [vmem:[%s1359_s27] sm:$0xff] }
  0x72   : > { %346 = vmatpush1.msra.mxu0 %v323_v12 }
  0x73   : > { %347 = vmatprep.subr.mxu0 %v322_v13 }
  0x74   : > { %348 = vmatpush1.msra.mxu0 %v321_v14 }
  0x75   : > { %349 = vmatprep.subr.mxu0 %v320_v15 }
  0x76   : > { %350 = vmatpush1.msra.mxu0 %v319_v16 }
  0x77   : > { %351 = vmatprep.subr.mxu0 %v318_v17 }
  0x78   : > { %352 = vmatpush1.msra.mxu0 %v317_v18 }
  0x79   : > { %353 = vmatprep.subr.mxu0 %v316_v19 }
  0x7a   : > { %354 = vmatpush1.msra.mxu0 %v315_v20 }
  0x7b   : > { %355 = vmatprep.subr.mxu0 %v314_v21 }
  0x7c   : > { %356 = vmatpush1.msra.mxu0 %v313_v22 }
  0x7d   : > { %357 = vmatprep.subr.mxu0 %v312_v23 }
  0x7e   : > { %358 = vmatpush1.msra.mxu0 %v311_v24 }
  0x7f   : > { %359 = vmatprep.subr.mxu0 %v310_v25 }
  0x80   : > { %360 = vmatpush1.msra.mxu0 %v309_v26 }
  0x81   : > { %361 = vmatprep.subr.mxu0 %v308_v27 }
  0x82   : > { %362 = vmatpush1.msra.mxu0 %v307_v28 }
  0x83   : > { %363 = vmatprep.subr.mxu0 %v306_v29 }
  0x84   : > { %364 = vmatpush1.msra.mxu0 %v305_v30 }
  0x85   : > { %365 = vmatprep.subr.mxu0 %v304_v31 }
  0x86   : > { %366 = vmatpush1.msra.mxu0 %v303_v32 }
  0x87   : > { %400 = vmatmul.mubr.f32.vlgmr.msra.gmra.mxu0 %v302_v33 }
 0x146   : > { %411 = sbr.rel (%p782_p8) target bundleno = 333 (0x14d), region = 60 }
 0x147   : > { %v401_v34 = vpop.f32.mrf.mxu0 }
 0x148   : > { %406 = vst [vmem:[#allocation2] sm:$0xff] %v401_v34 }
 0x149   : > { %v403_v35 = vpop.f32.mrf.mxu0 }
 0x14a   : > { %407 = vst [vmem:[#allocation2 + $0x8] sm:$0xff] %v403_v35 }
 0x14b   : > { %v1169_v36 = vmov 0.0  }
 0x14c   : > { %412 = vst [vmem:[#allocation3] sm:$0x3] %v1169_v36 }
 0x14d PF: > { %v556_v37 = vld [vmem:[#allocation9 + $0xf8] sm:$0xff]  ;;  %v555_v39 = vld [vmem:[#allocation9 + $0xf0] sm:$0xff]  ;;  %v554_v41 = vld [vmem:[#allocation9 + $0xe8] sm:$0xff]  ;;  %vm455_vm0 = vcmask 1040384   ;;  %vm472_vm1 = vcmask 1041408   ;;  %vm489_vm2 = vcmask 1043456  }
 0x14e   : > { %v540_v38 = vld [vmem:[#allocation9 + $0x78] sm:$0xff]  ;;  %796 = vmatprep.subr.mxu1 %v556_v37  ;;  %v539_v40 = vld [vmem:[#allocation9 + $0x70] sm:$0xff]  ;;  %v538_v42 = vld [vmem:[#allocation9 + $0x68] sm:$0xff]  ;;  %s832_s5 = smul.u32 3, %s1146_s22  ;;  %s653_s8 = sshll.u32 %s1376_s1, 4  ;;  %s654_s8 = int_to_ptr.vmem [resolvable:$true] %s653_s8 }
 0x14f   : > { %797 = vmatpush3.msra.mxu1 %v540_v38  ;;  %v553_v43 = vld [vmem:[#allocation9 + $0xe0] sm:$0xff]  ;;  %v552_v45 = vld [vmem:[#allocation9 + $0xd8] sm:$0xff]  ;;  %v551_v47 = vld [vmem:[#allocation9 + $0xd0] sm:$0xff]  ;;  %s1465_s17 = sld [smem:[#allocation23_spill]]  ;;  %s638_s22 = scalar_lea.sflag [#allocation6], %s1353_s3 }
 0x150   : > { %798 = vmatprep.subr.mxu1 %v555_v39  ;;  %v537_v44 = vld [vmem:[#allocation9 + $0x60] sm:$0xff]  ;;  %v536_v46 = vld [vmem:[#allocation9 + $0x58] sm:$0xff]  ;;  %v535_v48 = vld [vmem:[#allocation9 + $0x50] sm:$0xff]  ;;  %s649_s30 = sadd.s32 %s1142_s21, %s832_s5  ;;  %s1054_s9 = scalar_lea.vmem %s654_s8, 128 }
 0x151   : > { %799 = vmatpush3.msra.mxu1 %v539_v40  ;;  %v550_v49 = vld [vmem:[#allocation9 + $0xc8] sm:$0xff]  ;;  %v549_v51 = vld [vmem:[#allocation9 + $0xc0] sm:$0xff]  ;;  %v548_v53 = vld [vmem:[#allocation9 + $0xb8] sm:$0xff]  ;;  %s793_s7 = sshll.u32 %s649_s30, 7  ;;  %p1055_p1 = scmp.ne.s32.totalorder %s654_s8, %s1054_s9 }
 0x152   : > { %800 = vmatprep.subr.mxu1 %v554_v41  ;;  %v534_v50 = vld [vmem:[#allocation9 + $0x48] sm:$0xff]  ;;  %v533_v52 = vld [vmem:[#allocation9 + $0x40] sm:$0xff]  ;;  %v532_v54 = vld [vmem:[#allocation9 + $0x38] sm:$0xff]  ;;  %s1170_s21 = smov [#allocation12]  }
 0x153   : > { %801 = vmatpush3.msra.mxu1 %v538_v42  ;;  %v450_v55 = vld [vmem:[#allocation2] sm:$0xff]  ;;  %v451_v56 = vld [vmem:[#allocation2 + $0x8] sm:$0xff]  ;;  %v547_v61 = vld [vmem:[#allocation9 + $0xb0] sm:$0xff]  ;;  %p1056_p2 = pnand %p1055_p1, %p1316_p6  ;;  %s1058_s26 = sshll.u32 %s1170_s21, 4  ;;  %s1059_s26 = int_to_ptr.vmem [resolvable:$false] %s1058_s26 }
 0x154   : > { %802 = vmatprep.subr.mxu1 %v553_v43  ;;  %v783_v57 = vld [vmem:[#allocation10] ss:$0 sm:$0xff]  ;;  %v784_v58 = vld [vmem:[#allocation10 + $0x3] ss:$0 sm:$0xff]  ;;  %v453_v59 = vrot.slane %v450_v55, 7  ;;  %v458_v60 = vrot.slane %v451_v56, 7  ;;  %p1061_p7 = scmp.lt.s32.totalorder %s654_s8, %s1059_s26 }
 0x155   : > { %803 = vmatpush3.msra.mxu1 %v537_v44  ;;  %v531_v62 = vld [vmem:[#allocation9 + $0x30] sm:$0xff]  ;;  %v546_v1 = vld [vmem:[#allocation9 + $0xa8] sm:$0xff]  ;;  %v545_v7 = vld [vmem:[#allocation9 + $0xa0] sm:$0xff]  ;;  %s651_s11 = scalar_lea.hbm %s1465_s17, %s793_s7  ;;  %p1057_p4 = pneg %p1056_p2 }
 0x156   : > { %804 = vmatprep.subr.mxu1 %v552_v45  ;;  %v456_v63 = vsel %vm455_vm0, 0.0, %v453_v59  ;;  %v460_v0 = vsel %vm455_vm0, 0.0, %v458_v60  ;;  %v530_v6 = vld [vmem:[#allocation9 + $0x28] sm:$0xff]  ;;  %v529_v10 = vld [vmem:[#allocation9 + $0x20] sm:$0xff]  ;;  %v544_v11 = vld [vmem:[#allocation9 + $0x98] sm:$0xff]  ;;  %s1060_s14 = scalar_lea.vmem %s1059_s26, 256 }
 0x157   : > { %805 = vmatpush3.msra.mxu1 %v536_v46  ;;  %v461_v2 = vmul.f32 %v783_v57, %v456_v63  ;;  %v463_v3 = vmul.f32 %v784_v58, %v460_v0  ;;  %v465_v4 = vmul.f32 %v783_v57, %v460_v0  ;;  %v467_v5 = vmul.f32 %v784_v58, %v456_v63  ;;  %v528_v14 = vld [vmem:[#allocation9 + $0x18] sm:$0xff]  ;;  %v543_v15 = vld [vmem:[#allocation9 + $0x90] sm:$0xff]  ;;  %v785_v16 = vld [vmem:[#allocation10 + $0x1] ss:$0 sm:$0xff]  ;;  %p1062_p9 = scmp.lt.s32.totalorder %s1060_s14, %s1054_s9 }
 0x158   : > { %806 = vmatprep.subr.mxu1 %v551_v47  ;;  %v786_v17 = vld [vmem:[#allocation10 + $0x4] ss:$0 sm:$0xff]  ;;  %v527_v20 = vld [vmem:[#allocation9 + $0x10] sm:$0xff]  ;;  %v542_v21 = vld [vmem:[#allocation9 + $0x88] sm:$0xff] }
 0x159   : > { %807 = vmatpush3.msra.mxu1 %v535_v48  ;;  %v462_v8 = vadd.f32 %v461_v2, %v450_v55  ;;  %v466_v9 = vadd.f32 %v465_v4, %v451_v56  ;;  %v526_v24 = vld [vmem:[#allocation9 + $0x8] sm:$0xff]  ;;  %v541_v29 = vld [vmem:[#allocation9 + $0x80] sm:$0xff]  ;;  %p1063_p12 = por %p1062_p9, %p1061_p7 }
 0x15a   : > { %808 = vmatprep.subr.mxu1 %v550_v49  ;;  %v525_v30 = vld [vmem:[#allocation9] sm:$0xff]  ;;  %v789_v40 = vld [vmem:[#allocation3] ss:$0 sm:$0xff]  ;;  %v790_v41 = vld [vmem:[#allocation3 + $0x1] ss:$0 sm:$0xff] }
 0x15b   : > { %809 = vmatpush3.msra.mxu1 %v534_v50  ;;  %v464_v12 = vsub.f32 %v462_v8, %v463_v3  ;;  %v468_v13 = vadd.f32 %v467_v5, %v466_v9  ;;  %v787_v35 = vld [vmem:[#allocation10 + $0x2] ss:$0 sm:$0xff]  ;;  %v788_v36 = vld [vmem:[#allocation10 + $0x5] ss:$0 sm:$0xff]  ;;  %v443_v39 = vld [vmem:[#allocation10 + $0x6] sm:$0xff]  ;;  %p1064_p11 = pnand %p1063_p12, %p1057_p4 }
 0x15c   : > { %810 = vmatprep.subr.mxu1 %v549_v51  ;;  %v444_v48 = vld [vmem:[#allocation10 + $0xe] sm:$0xff]  ;;  %v515_v50 = vmul.f32 %v790_v41, %v443_v39 }
 0x15d   : > { %811 = vmatpush3.msra.mxu1 %v533_v52  ;;  %v470_v18 = vrot.slane %v464_v12, 6  ;;  %v475_v19 = vrot.slane %v468_v13, 6  ;;  %v511_v52 = vmul.f32 %v789_v40, %v443_v39  ;;  %v513_v56 = vmul.f32 %v790_v41, %v444_v48 }
 0x15e   : > { %812 = vmatprep.subr.mxu1 %v548_v53 }
 0x15f   : > { %813 = vmatpush3.msra.mxu1 %v532_v54  ;;  %v473_v22 = vsel %vm472_vm1, 0.0, %v470_v18  ;;  %v477_v23 = vsel %vm472_vm1, 0.0, %v475_v19  ;;  %v517_v54 = vmul.f32 %v789_v40, %v444_v48 }
 0x160   : > { %814 = vmatprep.subr.mxu1 %v547_v61  ;;  %v478_v25 = vmul.f32 %v785_v16, %v473_v22  ;;  %v480_v26 = vmul.f32 %v786_v17, %v477_v23  ;;  %v482_v27 = vmul.f32 %v785_v16, %v477_v23  ;;  %v484_v28 = vmul.f32 %v786_v17, %v473_v22  ;;  %v557_v61 = vld [vmem:[%s1359_s27] sm:$0xff] }
 0x161   : > { %815 = vmatpush3.msra.mxu1 %v531_v62  ;;  %v791_v62 = vld [vmem:[%s1435_s4] ss:$0 sm:$0xff] }
 0x162   : > { %816 = vmatprep.subr.mxu1 %v546_v1  ;;  %v479_v31 = vadd.f32 %v478_v25, %v464_v12  ;;  %v483_v32 = vadd.f32 %v482_v27, %v468_v13  ;;  %v565_v0 = vmul.f32 %v791_v62, %v557_v61 }
 0x163   : > { %817 = vmatpush3.msra.mxu1 %v530_v6 }
 0x164   : > { %818 = vmatprep.subr.mxu1 %v545_v7  ;;  %v481_v33 = vsub.f32 %v479_v31, %v480_v26  ;;  %v485_v34 = vadd.f32 %v484_v28, %v483_v32 }
 0x165   : > { %819 = vmatpush3.msra.mxu1 %v529_v10 }
 0x166   : > { %820 = vmatprep.subr.mxu1 %v544_v11  ;;  %v487_v37 = vrot.slane %v481_v33, 4  ;;  %v492_v38 = vrot.slane %v485_v34, 4 }
 0x167   : > { %821 = vmatpush3.msra.mxu1 %v528_v14 }
 0x168   : > { %822 = vmatprep.subr.mxu1 %v543_v15  ;;  %v490_v42 = vsel %vm489_vm2, 0.0, %v487_v37  ;;  %v494_v43 = vsel %vm489_vm2, 0.0, %v492_v38 }
 0x169   : > { %823 = vmatpush3.msra.mxu1 %v527_v20  ;;  %v495_v44 = vmul.f32 %v787_v35, %v490_v42  ;;  %v499_v45 = vmul.f32 %v787_v35, %v494_v43  ;;  %v501_v46 = vmul.f32 %v788_v36, %v490_v42  ;;  %v497_v47 = vmul.f32 %v788_v36, %v494_v43 }
 0x16a   : > { %824 = vmatprep.subr.mxu1 %v542_v21 }
 0x16b   : > { %825 = vmatpush3.msra.mxu1 %v526_v24  ;;  %v500_v49 = vadd.f32 %v499_v45, %v485_v34  ;;  %v496_v51 = vadd.f32 %v495_v44, %v481_v33 }
 0x16c   : > { %826 = vmatprep.subr.mxu1 %v541_v29 }
 0x16d   : > { %827 = vmatpush3.msra.mxu1 %v525_v30  ;;  %v502_v53 = vadd.f32 %v501_v46, %v500_v49  ;;  %v498_v55 = vsub.f32 %v496_v51, %v497_v47 }
 0x16f   : > { %v516_v57 = vadd.f32 %v515_v50, %v502_v53  ;;  %v512_v58 = vadd.f32 %v511_v52, %v498_v55 }
 0x171   : > { %v518_v59 = vadd.f32 %v517_v54, %v516_v57  ;;  %v514_v60 = vsub.f32 %v512_v58, %v513_v56 }
 0x173   : > { %520 = vst [vmem:[#allocation2 + $0x8] sm:$0xff] %v518_v59  ;;  %522 = vst [vmem:[#allocation3 - $0x6] sm:$0x80] %v518_v59  ;;  %630 = vmatprep.mubr.f32.mxu1 %v518_v59 }
 0x174   : > { %519 = vst [vmem:[#allocation2] sm:$0xff] %v514_v60  ;;  %521 = vst [vmem:[#allocation3 - $0x7] sm:$0x80] %v514_v60  ;;  %631 = vmatmul.mubr.f32.vlgmr.msra.gmra.mxu1 %v514_v60 }
 0x234   : > { %v828_v63 = vpop.f32.mrf.mxu1 }
 0x236   : > { %v829_v1 = vpop.f32.mrf.mxu1 }
 0x237   : > { %v830_v2 = vadd.f32 %v829_v1, %v828_v63 }
 0x239   : > { %v633_v3 = vadd.f32 %v830_v2, %v565_v0 }
 0x23b   : > { %636 = vst [vmem:[%s1376_s1] sm:$0xff] %v633_v3 }
 0x23c   : > { %1067 = shalt.err (!%p1064_p11)
}
 0x23d   : > { %s1068_s15 = scalar_lea.hbm %s651_s11, 128  ;;  %s1072_s12 = scalar_lea.hbm %s1465_s17, 768 }
 0x23e   : > { %p1069_p13 = scmp.ne.s32.totalorder %s651_s11, %s1068_s15  ;;  %p1073_p10 = scmp.lt.s32.totalorder %s651_s11, %s1465_s17 }
 0x23f   : > { %p1074_p5 = scmp.lt.s32.totalorder %s1072_s12, %s1068_s15 }
 0x240   : > { %p1070_p3 = pnand %p1069_p13, %p1316_p6 }
 0x241   : > { %p1075_p8 = por %p1074_p5, %p1073_p10 }
 0x242   : > { %p1071_p0 = pneg %p1070_p3 }
 0x244   : > { %p1076_p1 = pnand %p1075_p8, %p1071_p0 }
 0x246   : > { %1079 = shalt.err (!%p1076_p1)
}
 0x247   : > { %847 = dma.vmem_to_hbm [thread:$0]  (%p1316_p6), %s654_s8, 128, %s651_s11, %s638_s22  }
 0x248 PF: > { %s1466_s5 = sld [smem:[#allocation17_spill]]  ;;  %p874_p2 = scmp.ge.s32.totalorder %s1158_s25, 2 }
 0x249   : > { %s1467_s18 = sld [smem:[#allocation18_spill]] }
 0x24e   : > { %s665_s28 = sand.u32 1, %s1466_s5  }
 0x24f   : > { %p1468_p4 = scmp.ne.s32.totalorder %s1467_s18, 0  ;;  %s666_s30 = scalar_lea.sflag [#allocation6], %s665_s28 }
 0x251   : > { %p864_p7 = pnand %p874_p2, %p1468_p4 }
 0x253   : > { %p865_p9 = pneg %p864_p7 }
 0x255   : > { %1125 = dma.done.wait (%p865_p9), %s666_s30, 128  }
 0x256   : > { %1127 = vsyncadd (%p865_p9), %s666_s30, 4294967168  ;;  %s23_s25 = sadd.s32 1, %s1158_s25   ;;  %s1469_s13 = sld [smem:[#allocation19_spill]] }
 0x257   : > { %p20_p12 = scmp.ge.s32.totalorder %s23_s25, 8   ;;  %s1470_s18 = smov %s1134_s19 }
 0x258   : > { %s1471_s19 = smov %s1138_s20  ;;  %s1472_s20 = smov %s1333_s2 }
 0x259   : > { %s1473_s21 = smov %s1150_s23  ;;  %s1474_s22 = smov %s1154_s24 }
 0x25a   : > { %s1476_s24 = smov %s1482_s10  ;;  %22 = sbr.rel (!%p20_p12) target bundleno = 14 (0xe), region = 102 }
 0x25c   : > { %s1475_s23 = smov %s1469_s13 }
 0x25f   :  { %671 = vsyncpa [#allocation5], 1 }
 0x260   :  { %673 = vsyncpa [#allocation5 + $0x1], 1 }
 0x261   :  { %674 = vsyncpa [#allocation8], 1 }
 0x262   :  { %675 = vsyncpa [#allocation11], 1 }
 0x263   :  { %676 = vsyncpa [#allocation6], 1 }
 0x264   :  { %678 = vsyncpa [#allocation6 + $0x1], 1 }

</bundles_post_ra>
